<compile_context>
chip_gen: v7x
topology: tpu7x:2x2x1
jax: 0.10.0
libtpu: 0.0.40
codegen_flags: <defaults>
</compile_context>

<pallas_src>
import functools

import jax
import jax.numpy as jnp
from jax.experimental import pallas as pl
from jax.experimental.pallas import tpu as pltpu


def _neucf_kernel(
    xT_ref,    # (K, TILE_B)        concatenated [user | item] features, transposed
    wf_ref,    # (H1_pad, K)        folded (embedding->layer1) weight, transposed
    bf_ref,    # (H1_pad, 1)        folded bias, column
    w2T_ref,   # (H2_pad, H1_pad)   layer-2 weight, transposed
    b2_ref,    # (H2_pad, 1)
    w3_ref,    # (H2_pad, 1)        final-layer weight as a column
    b3_ref,    # (1, 1)
    out_ref,   # (1, TILE_B)        lane-dense output row
    *, use_sigmoid: bool):
  f32 = jnp.float32

  # Layer 1 (embedding already folded in): one short-K MXU pass + ReLU.
  h1 = jnp.maximum(
      jnp.dot(wf_ref[...], xT_ref[...], preferred_element_type=f32)
      + bf_ref[...], 0.0)                                    # (H1_pad, TILE_B)

  # Layer 2 + ReLU.
  h2 = jnp.maximum(
      jnp.dot(w2T_ref[...], h1, preferred_element_type=f32)
      + b2_ref[...], 0.0)                                    # (H2_pad, TILE_B)

  # Final 1-output linear: VPU multiply + sublane reduce (kept off the MXU).
  y = jnp.sum(h2 * w3_ref[...], axis=0, keepdims=True) + b3_ref[...]   # (1, TILE_B)

  if use_sigmoid:
    y = jax.nn.sigmoid(y)
  out_ref[...] = y.astype(out_ref.dtype)


def _round_up(x, m):
  return ((x + m - 1) // m) * m


def _cdiv(a, b):
  return (a + b - 1) // b


def neucf_forward(params, user, item, methods="regression", max_tile_b=2048):
  f32 = jnp.float32
  B, NU = user.shape
  NI = item.shape[1]
  F = params["w_user"].shape[1]
  H1 = params["w1"].shape[1]
  H2 = params["w2"].shape[1]
  K = NU + NI

  LANE = 128
  H1_pad = _round_up(H1, LANE)
  H2_pad = _round_up(H2, LANE)

  # ---- Exact fold of the embedding linears into decoder layer 1 (wrapper-side XLA) ----
  bd = jnp.zeros((K, 2 * F), f32)
  bd = bd.at[:NU, :F].set(params["w_user"].astype(f32))
  bd = bd.at[NU:, F:].set(params["w_item"].astype(f32))
  b_cat = jnp.concatenate([params["b_user"], params["b_item"]], axis=1).astype(f32)
  w1 = params["w1"].astype(f32)
  w_fold = bd @ w1                                        # (K, H1)
  b_fold = b_cat @ w1 + params["b1"].astype(f32)          # (1, H1)

  # ---- Transposed, lane-padded parameter packing (batch lives on lanes in-kernel) ----
  wfT = jnp.zeros((H1_pad, K), f32).at[:H1, :].set(w_fold.T)
  bf = jnp.zeros((H1_pad, 1), f32).at[:H1, :].set(b_fold.T)
  w2T = jnp.zeros((H2_pad, H1_pad), f32).at[:H2, :H1].set(params["w2"].astype(f32).T)
  b2 = jnp.zeros((H2_pad, 1), f32).at[:H2, :].set(params["b2"].astype(f32).T)
  w3 = jnp.zeros((H2_pad, 1), f32).at[:H2, :].set(params["w3"].astype(f32))
  b3 = params["b3"].astype(f32).reshape(1, 1)

  # ---- Batch tiling: 128-lane-aligned tiles; keep >=2 grid steps when splittable so
  #      both v7x TensorCores get work (harmless one extra ~0.35us step on v5e/v6e). ----
  B_lane = _round_up(B, LANE)
  num_tiles = max(_cdiv(B_lane, max_tile_b), 1)
  if num_tiles == 1 and B_lane >= 2 * LANE:
    num_tiles = 2
  TILE_B = _round_up(_cdiv(B_lane, num_tiles), LANE)
  B_pad = TILE_B * num_tiles

  # Concatenated input, transposed so the batch is the (lane-dense) minor dim.
  xT = jnp.concatenate([user, item], axis=1).astype(f32).T          # (K, B)
  if B_pad != B:
    xT = jnp.pad(xT, ((0, 0), (0, B_pad - B)))                      # (K, B_pad)

  kernel = functools.partial(_neucf_kernel,
                             use_sigmoid=(methods != "regression"))

  flops = 2 * B_pad * (K * H1_pad + H1_pad * H2_pad + H2_pad)
  transcendentals = B_pad if methods != "regression" else 0
  bytes_accessed = 4 * (xT.size + B_pad + wfT.size + bf.size + w2T.size
                        + b2.size + w3.size + b3.size)

  out = pl.pallas_call(
      kernel,
      out_shape=jax.ShapeDtypeStruct((1, B_pad), f32),
      grid=(num_tiles,),
      in_specs=[
          pl.BlockSpec((K, TILE_B), lambda i: (0, i)),        # batch-tiled input
          pl.BlockSpec((H1_pad, K), lambda i: (0, 0)),        # resident weights:
          pl.BlockSpec((H1_pad, 1), lambda i: (0, 0)),        #   constant index maps
          pl.BlockSpec((H2_pad, H1_pad), lambda i: (0, 0)),
          pl.BlockSpec((H2_pad, 1), lambda i: (0, 0)),
          pl.BlockSpec((H2_pad, 1), lambda i: (0, 0)),
          pl.BlockSpec((1, 1), lambda i: (0, 0)),
      ],
      out_specs=pl.BlockSpec((1, TILE_B), lambda i: (0, i)),  # lane-dense output row
      compiler_params=pltpu.CompilerParams(
          dimension_semantics=("parallel",),
          vmem_limit_bytes=32 * 1024 * 1024),
      cost_estimate=pl.CostEstimate(
          flops=flops, transcendentals=transcendentals,
          bytes_accessed=bytes_accessed),
  )(xT, wfT, bf, w2T, b2, w3, b3)

  return out[0, :B].reshape(B, 1)


def ref_forward(params, user, item, methods="regression"):
  """Pure-JAX reference mirroring the PyTorch forward exactly (no fold)."""
  ue = user @ params["w_user"] + params["b_user"]
  ie = item @ params["w_item"] + params["b_item"]
  x = jnp.concatenate([ue, ie], axis=1)
  h1 = jax.nn.relu(x @ params["w1"] + params["b1"])
  h2 = jax.nn.relu(h1 @ params["w2"] + params["b2"])
  y = h2 @ params["w3"] + params["b3"]
  return y if methods == "regression" else jax.nn.sigmoid(y)


def init_params(key, num_user, num_item, num_features):
  F = num_features
  H1 = F
  H2 = int(round(F / 2, 0))

  def linear(key, fan_in, fan_out):
    kw, kb = jax.random.split(key)
    bound = 1.0 / (fan_in ** 0.5)
    w = jax.random.uniform(kw, (fan_in, fan_out), jnp.float32, -bound, bound)
    b = jax.random.uniform(kb, (1, fan_out), jnp.float32, -bound, bound)
    return w, b

  keys = jax.random.split(key, 5)
  p = {}
  p["w_user"], p["b_user"] = linear(keys[0], num_user, F)
  p["w_item"], p["b_item"] = linear(keys[1], num_item, F)
  p["w1"], p["b1"] = linear(keys[2], 2 * F, H1)
  p["w2"], p["b2"] = linear(keys[3], H1, H2)
  p["w3"], p["b3"] = linear(keys[4], H2, 1)
  return p


if __name__ == "__main__":
  fwd = jax.jit(neucf_forward, static_argnames=("methods", "max_tile_b"))

  # Test 1: small spec-sized model, regression head, single grid step.
  B, NUM_USER, NUM_ITEM, NUM_FEATURES = 8, 11, 9, 32
  key = jax.random.PRNGKey(0)
  k_u, k_i, k_p = jax.random.split(key, 3)
  user = jax.random.normal(k_u, (B, NUM_USER), jnp.float32)
  item = jax.random.normal(k_i, (B, NUM_ITEM), jnp.float32)
  params = init_params(k_p, NUM_USER, NUM_ITEM, NUM_FEATURES)

  out = jax.block_until_ready(fwd(params, user, item, methods="regression"))
  ref = jax.block_until_ready(ref_forward(params, user, item, methods="regression"))
  assert out.shape == (B, 1), out.shape
  # atol relaxed to 1e-4: the embedding->layer1 fold reassociates f32 sums (exact math,
  # few-ulp numerical difference).
  assert jnp.allclose(out, ref, rtol=1e-4, atol=1e-4), (out, ref)

  # Test 2: bigger batch -> multi-tile parallel grid (exercises the v7x 2-core path,
  # batch padding, and the sigmoid head).
  B2, NU2, NI2, F2 = 300, 50, 40, 64
  k_u2, k_i2, k_p2 = jax.random.split(jax.random.PRNGKey(1), 3)
  user2 = jax.random.normal(k_u2, (B2, NU2), jnp.float32)
  item2 = jax.random.normal(k_i2, (B2, NI2), jnp.float32)
  params2 = init_params(k_p2, NU2, NI2, F2)

  out2 = jax.block_until_ready(fwd(params2, user2, item2, methods="classification"))
  ref2 = jax.block_until_ready(ref_forward(params2, user2, item2, methods="classification"))
  assert out2.shape == (B2, 1), out2.shape
  assert jnp.allclose(out2, ref2, rtol=1e-4, atol=1e-4), (out2, ref2)

  print("KERNEL_OK")
</pallas_src>

<mosaic_0001>
module attributes {stable_mosaic.version = 11 : i64} {
  func.func @_neucf_kernel(%arg0: i32, %arg1: memref<20x128xf32, #tpu.memory_space<vmem>>, %arg2: memref<128x20xf32, #tpu.memory_space<vmem>>, %arg3: memref<128x1xf32, #tpu.memory_space<vmem>>, %arg4: memref<128x128xf32, #tpu.memory_space<vmem>>, %arg5: memref<128x1xf32, #tpu.memory_space<vmem>>, %arg6: memref<128x1xf32, #tpu.memory_space<vmem>>, %arg7: memref<1x1xf32, #tpu.memory_space<vmem>>, %arg8: memref<1x128xf32, #tpu.memory_space<vmem>>) attributes {dimension_semantics = [#tpu.dimension_semantics<parallel>], iteration_bounds = array<i64: 1>, scalar_prefetch = 0 : i64, scratch_operands = 0 : i64, tpu.core_type = #tpu.core_type<tc>, window_params = [{transform_indices = @transform_0, window_bounds = array<i64: 20, 128>}, {pipeline_mode = #tpu.pipeline_mode<synchronous>, transform_indices = @transform_1, window_bounds = array<i64: 128, 20>}, {pipeline_mode = #tpu.pipeline_mode<synchronous>, transform_indices = @transform_2, window_bounds = array<i64: 128, 1>}, {pipeline_mode = #tpu.pipeline_mode<synchronous>, transform_indices = @transform_3, window_bounds = array<i64: 128, 128>}, {pipeline_mode = #tpu.pipeline_mode<synchronous>, transform_indices = @transform_4, window_bounds = array<i64: 128, 1>}, {pipeline_mode = #tpu.pipeline_mode<synchronous>, transform_indices = @transform_5, window_bounds = array<i64: 128, 1>}, {pipeline_mode = #tpu.pipeline_mode<synchronous>, transform_indices = @transform_6, window_bounds = array<i64: 1, 1>}, {transform_indices = @transform_7, window_bounds = array<i64: 1, 128>}]} {
    %c0 = arith.constant 0 : index
    %c0_0 = arith.constant 0 : index
    %0 = vector.load %arg2[%c0, %c0_0] : memref<128x20xf32, #tpu.memory_space<vmem>>, vector<128x20xf32>
    %c0_1 = arith.constant 0 : index
    %c0_2 = arith.constant 0 : index
    %1 = vector.load %arg1[%c0_1, %c0_2] : memref<20x128xf32, #tpu.memory_space<vmem>>, vector<20x128xf32>
    %cst = arith.constant dense<0.000000e+00> : vector<128x128xf32>
    %2 = tpu.matmul %0, %1, %cst {dimension_numbers = #tpu.dot_dimension_numbers<[1], [0], [0], [1], [0, 0, 1, 1], [], []>} : vector<128x20xf32>, vector<20x128xf32>, vector<128x128xf32> -> vector<128x128xf32>
    %c0_3 = arith.constant 0 : index
    %c0_4 = arith.constant 0 : index
    %3 = vector.load %arg3[%c0_3, %c0_4] : memref<128x1xf32, #tpu.memory_space<vmem>>, vector<128x1xf32>
    %4 = vector.broadcast %3 : vector<128x1xf32> to vector<128x128xf32>
    %5 = arith.addf %2, %4 : vector<128x128xf32>
    %cst_5 = arith.constant 0.000000e+00 : f32
    %6 = vector.broadcast %cst_5 : f32 to vector<128x128xf32>
    %7 = arith.maximumf %5, %6 : vector<128x128xf32>
    %c0_6 = arith.constant 0 : index
    %c0_7 = arith.constant 0 : index
    %8 = vector.load %arg4[%c0_6, %c0_7] : memref<128x128xf32, #tpu.memory_space<vmem>>, vector<128x128xf32>
    %cst_8 = arith.constant dense<0.000000e+00> : vector<128x128xf32>
    %9 = tpu.matmul %8, %7, %cst_8 {dimension_numbers = #tpu.dot_dimension_numbers<[1], [0], [0], [1], [0, 0, 1, 1], [], []>} : vector<128x128xf32>, vector<128x128xf32>, vector<128x128xf32> -> vector<128x128xf32>
    %c0_9 = arith.constant 0 : index
    %c0_10 = arith.constant 0 : index
    %10 = vector.load %arg5[%c0_9, %c0_10] : memref<128x1xf32, #tpu.memory_space<vmem>>, vector<128x1xf32>
    %11 = vector.broadcast %10 : vector<128x1xf32> to vector<128x128xf32>
    %12 = arith.addf %9, %11 : vector<128x128xf32>
    %cst_11 = arith.constant 0.000000e+00 : f32
    %13 = vector.broadcast %cst_11 : f32 to vector<128x128xf32>
    %14 = arith.maximumf %12, %13 : vector<128x128xf32>
    %c0_12 = arith.constant 0 : index
    %c0_13 = arith.constant 0 : index
    %15 = vector.load %arg6[%c0_12, %c0_13] : memref<128x1xf32, #tpu.memory_space<vmem>>, vector<128x1xf32>
    %16 = vector.broadcast %15 : vector<128x1xf32> to vector<128x128xf32>
    %17 = arith.mulf %14, %16 : vector<128x128xf32>
    %cst_14 = arith.constant dense<0.000000e+00> : vector<128xf32>
    %18 = vector.multi_reduction <add>, %17, %cst_14 [0] : vector<128x128xf32> to vector<128xf32>
    %19 = vector.shape_cast %18 : vector<128xf32> to vector<1x128xf32>
    %c0_15 = arith.constant 0 : index
    %c0_16 = arith.constant 0 : index
    %20 = vector.load %arg7[%c0_15, %c0_16] : memref<1x1xf32, #tpu.memory_space<vmem>>, vector<1x1xf32>
    %21 = vector.broadcast %20 : vector<1x1xf32> to vector<1x128xf32>
    %22 = arith.addf %19, %21 : vector<1x128xf32>
    %c0_17 = arith.constant 0 : index
    %c0_18 = arith.constant 0 : index
    %23 = vector.load %arg8[%c0_17, %c0_18] : memref<1x128xf32, #tpu.memory_space<vmem>>, vector<1x128xf32>
    tpu.vector_store %arg8[%c0_17, %c0_18], %22 {strides = array<i32>} : memref<1x128xf32, #tpu.memory_space<vmem>>, vector<1x128xf32>,
    return
  }
  func.func @transform_0(%arg0: i32) -> (i32, i32) {
    %c0_i32 = arith.constant 0 : i32
    %c0_i32_0 = arith.constant 0 : i32
    return %c0_i32, %arg0 : i32, i32
  }
  func.func @transform_1(%arg0: i32) -> (i32, i32) {
    %c0_i32 = arith.constant 0 : i32
    %c0_i32_0 = arith.constant 0 : i32
    %c0_i32_1 = arith.constant 0 : i32
    return %c0_i32, %c0_i32_0 : i32, i32
  }
  func.func @transform_2(%arg0: i32) -> (i32, i32) {
    %c0_i32 = arith.constant 0 : i32
    %c0_i32_0 = arith.constant 0 : i32
    %c0_i32_1 = arith.constant 0 : i32
    return %c0_i32, %c0_i32_0 : i32, i32
  }
  func.func @transform_3(%arg0: i32) -> (i32, i32) {
    %c0_i32 = arith.constant 0 : i32
    %c0_i32_0 = arith.constant 0 : i32
    %c0_i32_1 = arith.constant 0 : i32
    return %c0_i32, %c0_i32_0 : i32, i32
  }
  func.func @transform_4(%arg0: i32) -> (i32, i32) {
    %c0_i32 = arith.constant 0 : i32
    %c0_i32_0 = arith.constant 0 : i32
    %c0_i32_1 = arith.constant 0 : i32
    return %c0_i32, %c0_i32_0 : i32, i32
  }
  func.func @transform_5(%arg0: i32) -> (i32, i32) {
    %c0_i32 = arith.constant 0 : i32
    %c0_i32_0 = arith.constant 0 : i32
    %c0_i32_1 = arith.constant 0 : i32
    return %c0_i32, %c0_i32_0 : i32, i32
  }
  func.func @transform_6(%arg0: i32) -> (i32, i32) {
    %c0_i32 = arith.constant 0 : i32
    %c0_i32_0 = arith.constant 0 : i32
    %c0_i32_1 = arith.constant 0 : i32
    return %c0_i32, %c0_i32_0 : i32, i32
  }
  func.func @transform_7(%arg0: i32) -> (i32, i32) {
    %c0_i32 = arith.constant 0 : i32
    %c0_i32_0 = arith.constant 0 : i32
    return %c0_i32, %arg0 : i32, i32
  }
}

</mosaic_0001>

<bundles_post_ra>
// kernel: neucf_forward.1
= control target key start
LH: loop header
LB: loop body
LE: loop exit
PB: predicated region body
PF: predicated region fallthrough
CT: control target
= control target key end

     0   :  { %v988_v0 = vmov 0   ;;  %vm143_vm0 = vcmask 162816   ;;  %vm192_vm1 = vcmask 1043456   ;;  %s1300_s2 = inlined_call_operand.vmem [shape: f32[128,1], index: 2, kind: input, shape index: {}]   ;;  %s1301_s0 = inlined_call_operand.vmem [shape: f32[20,128], index: 0, kind: input, shape index: {}]   ;;  %s1302_s1 = inlined_call_operand.vmem [shape: f32[128,20], index: 1, kind: input, shape index: {}]   ;;  %s1303_s6 = inlined_call_operand.<no memory space> [shape: f32[1,1], index: 6, kind: input, shape index: {}]   ;;  %s1304_s4 = inlined_call_operand.vmem [shape: f32[128,1], index: 4, kind: input, shape index: {}]   ;;  %s1305_s5 = inlined_call_operand.vmem [shape: f32[128,1], index: 5, kind: input, shape index: {}]   ;;  %s1306_s3 = inlined_call_operand.vmem [shape: f32[128,128], index: 3, kind: input, shape index: {}]   ;;  %s1307_s7 = inlined_call_operand.vmem [shape: f32[1,128], index: 7, kind: output, shape index: {}]  }
   0x1   :  { %986 = vset.pattern.permute.xlu0 %v988_v0  ;;  %987 = vset.pattern.permute.xlu1 %v988_v0  ;;  %v47_v1 = vld [vmem:[%s1300_s2] sm:$0xff]  ;;  %v49_v2 = vld [vmem:[%s1300_s2 + $0x10] sm:$0xff]  ;;  %v12_v4 = vstv %s1303_s6  ;;  %v45_v5 = vld [vmem:[%s1301_s0 + $0x8] sm:$0xff] }
   0x2   :  { %v44_v3 = vld [vmem:[%s1301_s0] sm:$0xff]  ;;  %65 = vperm.xlu0 %986, %v47_v1   ;;  %75 = vperm.xlu1 %987, %v49_v2   ;;  %13 = vst [vmem:[#allocation2] sm:$0x1] %v12_v4  ;;  %v48_v7 = vld [vmem:[%s1300_s2 + $0x8] sm:$0xff]  ;;  %v50_v9 = vld [vmem:[%s1300_s2 + $0x18] sm:$0xff] }
   0x3   :  { %v933_v6 = vpack.c.bf16 %v45_v5, %v44_v3  ;;  %v28_v8 = vld [vmem:[%s1302_s1] sm:$0xff]  ;;  %v46_v10 = vld [vmem:[%s1301_s0 + $0x10] sm:$0xf]  ;;  %v29_v12 = vld [vmem:[%s1302_s1 + $0x8] sm:$0xff] }
   0x4   :  { %853 = vmatprep.mubr.msk.f32.mxu0 %vm143_vm0, %v28_v8  ;;  %v51_v11 = vld [vmem:[%s1300_s2 + $0x20] sm:$0xff]  ;;  %v52_v13 = vld [vmem:[%s1300_s2 + $0x28] sm:$0xff]  ;;  %v30_v14 = vld [vmem:[%s1302_s1 + $0x10] sm:$0xff] }
   0x5   :  { %934 = vmatprep.subr.bf16.mxu0 %v933_v6  ;;  %v53_v15 = vld [vmem:[%s1300_s2 + $0x30] sm:$0xff]  ;;  %v31_v16 = vld [vmem:[%s1302_s1 + $0x18] sm:$0xff]  ;;  %v32_v18 = vld [vmem:[%s1302_s1 + $0x20] sm:$0xff] }
   0x6   :  { %936 = vmatpush3.bf16.msra.mxu0 %v933_v6  ;;  %70 = vperm.xlu0 %986, %v48_v7   ;;  %v54_v17 = vld [vmem:[%s1300_s2 + $0x38] sm:$0xff]  ;;  %v55_v19 = vld [vmem:[%s1300_s2 + $0x40] sm:$0xff]  ;;  %v33_v20 = vld [vmem:[%s1302_s1 + $0x28] sm:$0xff] }
   0x7   :  { %80 = vperm.xlu1 %987, %v50_v9   ;;  %851 = vmatprep.subr.msk.mxu0 %vm192_vm1, %v46_v10  ;;  %v56_v21 = vld [vmem:[%s1300_s2 + $0x48] sm:$0xff]  ;;  %v34_v22 = vld [vmem:[%s1302_s1 + $0x30] sm:$0xff]  ;;  %v35_v24 = vld [vmem:[%s1302_s1 + $0x38] sm:$0xff] }
   0x8   :  { %v57_v23 = vld [vmem:[%s1300_s2 + $0x50] sm:$0xff]  ;;  %v58_v25 = vld [vmem:[%s1300_s2 + $0x58] sm:$0xff]  ;;  %v36_v26 = vld [vmem:[%s1302_s1 + $0x40] sm:$0xff] }
   0x9   :  { %v59_v27 = vld [vmem:[%s1300_s2 + $0x60] sm:$0xff]  ;;  %v37_v28 = vld [vmem:[%s1302_s1 + $0x48] sm:$0xff]  ;;  %v38_v30 = vld [vmem:[%s1302_s1 + $0x50] sm:$0xff] }
   0xa   :  { %852 = vmatpush3.msk.msra.mxu0 %vm192_vm1, %v46_v10  ;;  %85 = vperm.xlu0 %986, %v51_v11   ;;  %v60_v29 = vld [vmem:[%s1300_s2 + $0x68] sm:$0xff]  ;;  %v61_v31 = vld [vmem:[%s1300_s2 + $0x70] sm:$0xff]  ;;  %v39_v32 = vld [vmem:[%s1302_s1 + $0x58] sm:$0xff] }
   0xb   :  { %854 = vmatmul.mubr.msk.f32.vlgmr.msra.gmra.mrb[0].mxu0 %vm143_vm0, %v29_v12  ;;  %90 = vperm.xlu1 %987, %v52_v13   ;;  %v62_v33 = vld [vmem:[%s1300_s2 + $0x78] sm:$0xff]  ;;  %v40_v34 = vld [vmem:[%s1302_s1 + $0x60] sm:$0xff]  ;;  %v41_v36 = vld [vmem:[%s1302_s1 + $0x68] sm:$0xff] }
   0xc   :  { %856 = vmatprep.mubr.msk.f32.mxu0 %vm143_vm0, %v30_v14  ;;  %v373_v35 = vld [vmem:[%s1304_s4] sm:$0xff]  ;;  %v374_v37 = vld [vmem:[%s1304_s4 + $0x8] sm:$0xff]  ;;  %v42_v38 = vld [vmem:[%s1302_s1 + $0x70] sm:$0xff] }
   0xd   :  { %v375_v39 = vld [vmem:[%s1304_s4 + $0x10] sm:$0xff]  ;;  %v43_v40 = vld [vmem:[%s1302_s1 + $0x78] sm:$0xff]  ;;  %v377_v42 = vld [vmem:[%s1304_s4 + $0x20] sm:$0xff] }
   0xe   :  { %95 = vperm.xlu0 %986, %v53_v15   ;;  %v376_v41 = vld [vmem:[%s1304_s4 + $0x18] sm:$0xff]  ;;  %v378_v43 = vld [vmem:[%s1304_s4 + $0x28] sm:$0xff]  ;;  %v630_v44 = vld [vmem:[%s1305_s5] sm:$0xff] }
   0xf   :  { %857 = vmatmul.mubr.msk.f32.gmra.mrb[2].mxu0 %vm143_vm0, %v31_v16  ;;  %100 = vperm.xlu1 %987, %v54_v17   ;;  %v631_v45 = vld [vmem:[%s1305_s5 + $0x8] sm:$0xff]  ;;  %v632_v46 = vld [vmem:[%s1305_s5 + $0x10] sm:$0xff]  ;;  %v633_v47 = vld [vmem:[%s1305_s5 + $0x18] sm:$0xff] }
  0x10   :  { %859 = vmatprep.mubr.msk.f32.mxu0 %vm143_vm0, %v32_v18  ;;  %v379_v48 = vld [vmem:[%s1304_s4 + $0x30] sm:$0xff]  ;;  %v634_v49 = vld [vmem:[%s1305_s5 + $0x20] sm:$0xff]  ;;  %v380_v50 = vld [vmem:[%s1304_s4 + $0x38] sm:$0xff] }
  0x11   :  { %v635_v51 = vld [vmem:[%s1305_s5 + $0x28] sm:$0xff]  ;;  %v381_v52 = vld [vmem:[%s1304_s4 + $0x40] sm:$0xff]  ;;  %v636_v53 = vld [vmem:[%s1305_s5 + $0x30] sm:$0xff] }
  0x12   :  { %105 = vperm.xlu0 %986, %v55_v19   ;;  %v382_v54 = vld [vmem:[%s1304_s4 + $0x48] sm:$0xff]  ;;  %v637_v55 = vld [vmem:[%s1305_s5 + $0x38] sm:$0xff]  ;;  %v383_v56 = vld [vmem:[%s1304_s4 + $0x50] sm:$0xff] }
  0x13   :  { %860 = vmatmul.mubr.msk.f32.gmra.mrb[4].mxu0 %vm143_vm0, %v33_v20  ;;  %110 = vperm.xlu1 %987, %v56_v21   ;;  %v638_v57 = vld [vmem:[%s1305_s5 + $0x40] sm:$0xff]  ;;  %v384_v58 = vld [vmem:[%s1304_s4 + $0x58] sm:$0xff]  ;;  %v639_v59 = vld [vmem:[%s1305_s5 + $0x48] sm:$0xff] }
  0x14   :  { %862 = vmatprep.mubr.msk.f32.mxu0 %vm143_vm0, %v34_v22  ;;  %v385_v60 = vld [vmem:[%s1304_s4 + $0x60] sm:$0xff]  ;;  %v640_v61 = vld [vmem:[%s1305_s5 + $0x50] sm:$0xff]  ;;  %v386_v62 = vld [vmem:[%s1304_s4 + $0x68] sm:$0xff] }
  0x15   :  { %v641_v63 = vld [vmem:[%s1305_s5 + $0x58] sm:$0xff]  ;;  %v387_v0 = vld [vmem:[%s1304_s4 + $0x70] sm:$0xff]  ;;  %v642_v1 = vld [vmem:[%s1305_s5 + $0x60] sm:$0xff] }
  0x16   :  { %115 = vperm.xlu0 %986, %v57_v23   ;;  %v388_v2 = vld [vmem:[%s1304_s4 + $0x78] sm:$0xff]  ;;  %v643_v3 = vld [vmem:[%s1305_s5 + $0x68] sm:$0xff]  ;;  %v644_v4 = vld [vmem:[%s1305_s5 + $0x70] sm:$0xff] }
  0x17   :  { %863 = vmatmul.mubr.msk.f32.gmra.mrb[6].mxu0 %vm143_vm0, %v35_v24  ;;  %120 = vperm.xlu1 %987, %v58_v25   ;;  %v645_v5 = vld [vmem:[%s1305_s5 + $0x78] sm:$0xff]  ;;  %v763_v6 = vld [vmem:[#allocation2] sm:$0x1]  ;;  %v363_v8 = vld [vmem:[%s1306_s3 + $0x30] sm:$0xff] }
  0x18   :  { %865 = vmatprep.mubr.msk.f32.mxu0 %vm143_vm0, %v36_v26  ;;  %v357_v7 = vld [vmem:[%s1306_s3] sm:$0xff]  ;;  %918 = vmatprep.mubr.f32.mxu1 %v363_v8 }
  0x1a   :  { %125 = vperm.xlu0 %986, %v59_v27  }
  0x1b   :  { %866 = vmatmul.mubr.msk.f32.gmra.mrb[8].mxu0 %vm143_vm0, %v37_v28  ;;  %130 = vperm.xlu1 %987, %v60_v29  }
  0x1c   :  { %868 = vmatprep.mubr.msk.f32.mxu0 %vm143_vm0, %v38_v30 }
  0x1e   :  { %135 = vperm.xlu0 %986, %v61_v31  }
  0x1f   :  { %869 = vmatmul.mubr.msk.f32.gmra.mrb[10].mxu0 %vm143_vm0, %v39_v32  ;;  %140 = vperm.xlu1 %987, %v62_v33  }
  0x20   :  { %871 = vmatprep.mubr.msk.f32.mxu0 %vm143_vm0, %v40_v34 }
  0x22   :  { %391 = vperm.xlu0 %986, %v373_v35  }
  0x23   :  { %872 = vmatmul.mubr.msk.f32.gmra.mrb[12].mxu0 %vm143_vm0, %v41_v36  ;;  %396 = vperm.xlu1 %987, %v374_v37  }
  0x24   :  { %874 = vmatprep.mubr.msk.f32.mxu0 %vm143_vm0, %v42_v38 }
  0x26   :  { %401 = vperm.xlu0 %986, %v375_v39  }
  0x27   :  { %875 = vmatmul.mubr.msk.f32.gmra.mrb[14].mxu0 %vm143_vm0, %v43_v40  ;;  %406 = vperm.xlu1 %987, %v376_v41  }
  0x28   :  { %909 = vmatprep.mubr.f32.mxu0 %v357_v7 }
  0x2a   :  { %411 = vperm.xlu0 %986, %v377_v42  }
  0x2b   :  { %416 = vperm.xlu1 %987, %v378_v43  }
  0x2e   :  { %648 = vperm.xlu0 %986, %v630_v44  }
  0x2f   :  { %653 = vperm.xlu1 %987, %v631_v45  }
  0x32   :  { %658 = vperm.xlu0 %986, %v632_v46  }
  0x33   :  { %663 = vperm.xlu1 %987, %v633_v47  }
  0x36   :  { %421 = vperm.xlu0 %986, %v379_v48  }
  0x37   :  { %668 = vperm.xlu1 %987, %v634_v49  }
  0x3a   :  { %426 = vperm.xlu0 %986, %v380_v50  }
  0x3b   :  { %673 = vperm.xlu1 %987, %v635_v51  }
  0x3e   :  { %431 = vperm.xlu0 %986, %v381_v52  }
  0x3f   :  { %678 = vperm.xlu1 %987, %v636_v53  }
  0x42   :  { %436 = vperm.xlu0 %986, %v382_v54  }
  0x43   :  { %683 = vperm.xlu1 %987, %v637_v55  }
  0x46   :  { %441 = vperm.xlu0 %986, %v383_v56  }
  0x47   :  { %688 = vperm.xlu1 %987, %v638_v57  }
  0x4a   :  { %446 = vperm.xlu0 %986, %v384_v58  }
  0x4b   :  { %693 = vperm.xlu1 %987, %v639_v59  }
  0x4e   :  { %451 = vperm.xlu0 %986, %v385_v60  }
  0x4f   :  { %698 = vperm.xlu1 %987, %v640_v61  }
  0x52   :  { %456 = vperm.xlu0 %986, %v386_v62  }
  0x53   :  { %703 = vperm.xlu1 %987, %v641_v63  }
  0x56   :  { %461 = vperm.xlu0 %986, %v387_v0  }
  0x57   :  { %708 = vperm.xlu1 %987, %v642_v1  }
  0x5a   :  { %466 = vperm.xlu0 %986, %v388_v2  }
  0x5b   :  { %713 = vperm.xlu1 %987, %v643_v3  }
  0x5e   :  { %718 = vperm.xlu0 %986, %v644_v4  }
  0x5f   :  { %723 = vperm.xlu1 %987, %v645_v5  }
  0x62   :  { %766 = vperm.xlu0 %986, %v763_v6  }
  0x81   :  { %v76_v9 = vpop.permute.xlu1 %75  ;;  %v66_v10 = vpop.permute.xlu0 %65 }
  0x85   :  { %v71_v12 = vpop.permute.xlu0 %70 }
  0x86   :  { %v81_v11 = vpop.permute.xlu1 %80 }
  0x89   :  { %v86_v14 = vpop.permute.xlu0 %85 }
  0x8a   :  { %v91_v13 = vpop.permute.xlu1 %90 }
  0x8d   :  { %v96_v23 = vpop.permute.xlu0 %95 }
  0x8e   :  { %v101_v20 = vpop.permute.xlu1 %100 }
  0x91   :  { %v106_v36 = vpop.permute.xlu0 %105 }
  0x92   :  { %v111_v33 = vpop.permute.xlu1 %110 }
  0x95   :  { %v116_v48 = vpop.permute.xlu0 %115 }
  0x96   :  { %v121_v45 = vpop.permute.xlu1 %120 }
  0x99   :  { %v126_v61 = vpop.permute.xlu0 %125 }
  0x9a   :  { %v131_v58 = vpop.permute.xlu1 %130 }
  0x9e   :  { %v141_v6 = vpop.permute.xlu1 %140 }
  0xde   :  { %v855_v15 = vpop.f32.mrb[0].mxu0 }
  0xdf   :  { %v268_v16 = vadd.f32 %v855_v15, %v71_v12  ;;  %v262_v17 = vpop.f32.mrb[1].mxu0 }
  0xe0   :  { %v263_v18 = vadd.f32 %v262_v17, %v66_v10  ;;  %v358_v17 = vld [vmem:[%s1306_s3 + $0x8] sm:$0xff] }
  0xe1   :  { %v342_v19 = vmax.f32 %v268_v16, 0.0 }
  0xe2   :  { %v341_v21 = vmax.f32 %v263_v18, 0.0  ;;  %v858_v22 = vpop.f32.mrb[2].mxu0  ;;  %v364_v18 = vld [vmem:[%s1306_s3 + $0x38] sm:$0xff] }
  0xe3   :  { %v278_v24 = vadd.f32 %v858_v22, %v81_v11  ;;  %v272_v25 = vpop.f32.mrb[3].mxu0  ;;  %v366_v22 = vld [vmem:[%s1306_s3 + $0x48] sm:$0xff] }
  0xe4   :  { %v937_v26 = vpack.c.bf16 %v342_v19, %v341_v21  ;;  %v273_v27 = vadd.f32 %v272_v25, %v76_v9  ;;  %v136_v9 = vpop.permute.xlu0 %135  ;;  %v359_v19 = vld [vmem:[%s1306_s3 + $0x10] sm:$0xff]  ;;  %v360_v21 = vld [vmem:[%s1306_s3 + $0x18] sm:$0xff]  ;;  %v362_v25 = vld [vmem:[%s1306_s3 + $0x28] sm:$0xff] }
  0xe5   :  { %v344_v28 = vmax.f32 %v278_v24, 0.0  ;;  %v367_v24 = vld [vmem:[%s1306_s3 + $0x50] sm:$0xff] }
  0xe6   :  { %v343_v29 = vmax.f32 %v273_v27, 0.0  ;;  %v861_v30 = vpop.f32.mrb[4].mxu0  ;;  %938 = vmatprep.subr.bf16.mxu0 %v937_v26  ;;  %969 = vmatprep.subr.bf16.mxu1 %v937_v26  ;;  %v369_v27 = vld [vmem:[%s1306_s3 + $0x60] sm:$0xff] }
  0xe7   :  { %v288_v31 = vadd.f32 %v861_v30, %v91_v13  ;;  %v282_v32 = vpop.f32.mrb[5].mxu0  ;;  %940 = vmatpush3.bf16.msra.mxu0 %v937_v26  ;;  %977 = vmatpush3.bf16.msra.mxu1 %v937_v26  ;;  %v368_v26 = vld [vmem:[%s1306_s3 + $0x58] sm:$0xff] }
  0xe8   :  { %v941_v34 = vpack.c.bf16 %v344_v28, %v343_v29  ;;  %v283_v35 = vadd.f32 %v282_v32, %v86_v14  ;;  %v370_v28 = vld [vmem:[%s1306_s3 + $0x68] sm:$0xff]  ;;  %v371_v29 = vld [vmem:[%s1306_s3 + $0x70] sm:$0xff]  ;;  %v372_v30 = vld [vmem:[%s1306_s3 + $0x78] sm:$0xff]  ;;  %v397_v32 = vpop.permute.xlu1 %396 }
  0xe9   :  { %v346_v37 = vmax.f32 %v288_v31, 0.0  ;;  %v392_v31 = vpop.permute.xlu0 %391 }
  0xea   :  { %v345_v38 = vmax.f32 %v283_v35, 0.0  ;;  %v864_v39 = vpop.f32.mrb[6].mxu0  ;;  %942 = vmatprep.subr.bf16.mxu0 %v941_v34  ;;  %970 = vmatprep.subr.bf16.mxu1 %v941_v34 }
  0xeb   :  { %v298_v40 = vadd.f32 %v864_v39, %v101_v20  ;;  %v292_v41 = vpop.f32.mrb[7].mxu0  ;;  %944 = vmatpush3.bf16.msra.mxu0 %v941_v34  ;;  %978 = vmatpush3.bf16.msra.mxu1 %v941_v34  ;;  %v365_v20 = vld [vmem:[%s1306_s3 + $0x40] sm:$0xff] }
  0xec   :  { %v945_v42 = vpack.c.bf16 %v346_v37, %v345_v38  ;;  %v293_v43 = vadd.f32 %v292_v41, %v96_v23  ;;  %v361_v23 = vld [vmem:[%s1306_s3 + $0x20] sm:$0xff]  ;;  %v407_v34 = vpop.permute.xlu1 %406 }
  0xed   :  { %v348_v44 = vmax.f32 %v298_v40, 0.0 }
  0xee   :  { %v347_v46 = vmax.f32 %v293_v43, 0.0  ;;  %v867_v47 = vpop.f32.mrb[8].mxu0  ;;  %946 = vmatprep.subr.bf16.mxu0 %v945_v42  ;;  %971 = vmatprep.subr.bf16.mxu1 %v945_v42 }
  0xef   :  { %v308_v49 = vadd.f32 %v867_v47, %v111_v33  ;;  %v302_v50 = vpop.f32.mrb[9].mxu0  ;;  %948 = vmatpush3.bf16.msra.mxu0 %v945_v42  ;;  %979 = vmatpush3.bf16.msra.mxu1 %v945_v42  ;;  %v402_v33 = vpop.permute.xlu0 %401 }
  0xf0   :  { %v949_v51 = vpack.c.bf16 %v348_v44, %v347_v46  ;;  %v303_v52 = vadd.f32 %v302_v50, %v106_v36  ;;  %v417_v36 = vpop.permute.xlu1 %416 }
  0xf1   :  { %v350_v53 = vmax.f32 %v308_v49, 0.0 }
  0xf2   :  { %v349_v54 = vmax.f32 %v303_v52, 0.0  ;;  %v870_v55 = vpop.f32.mrb[10].mxu0  ;;  %950 = vmatprep.subr.bf16.mxu0 %v949_v51  ;;  %972 = vmatprep.subr.bf16.mxu1 %v949_v51 }
  0xf3   :  { %v318_v56 = vadd.f32 %v870_v55, %v121_v45  ;;  %v312_v57 = vpop.f32.mrb[11].mxu0  ;;  %952 = vmatpush3.bf16.msra.mxu0 %v949_v51  ;;  %980 = vmatpush3.bf16.msra.mxu1 %v949_v51  ;;  %v412_v35 = vpop.permute.xlu0 %411 }
  0xf4   :  { %v953_v59 = vpack.c.bf16 %v350_v53, %v349_v54  ;;  %v313_v60 = vadd.f32 %v312_v57, %v116_v48  ;;  %v654_v38 = vpop.permute.xlu1 %653 }
  0xf5   :  { %v352_v62 = vmax.f32 %v318_v56, 0.0 }
  0xf6   :  { %v351_v63 = vmax.f32 %v313_v60, 0.0  ;;  %v873_v0 = vpop.f32.mrb[12].mxu0  ;;  %954 = vmatprep.subr.bf16.mxu0 %v953_v59  ;;  %973 = vmatprep.subr.bf16.mxu1 %v953_v59 }
  0xf7   :  { %v328_v1 = vadd.f32 %v873_v0, %v131_v58  ;;  %v322_v2 = vpop.f32.mrb[13].mxu0  ;;  %956 = vmatpush3.bf16.msra.mxu0 %v953_v59  ;;  %981 = vmatpush3.bf16.msra.mxu1 %v953_v59  ;;  %v649_v37 = vpop.permute.xlu0 %648 }
  0xf8   :  { %v957_v3 = vpack.c.bf16 %v352_v62, %v351_v63  ;;  %v323_v4 = vadd.f32 %v322_v2, %v126_v61  ;;  %v664_v40 = vpop.permute.xlu1 %663 }
  0xf9   :  { %v354_v5 = vmax.f32 %v328_v1, 0.0 }
  0xfa   :  { %v353_v7 = vmax.f32 %v323_v4, 0.0  ;;  %v876_v8 = vpop.f32.mrb[14].mxu0  ;;  %958 = vmatprep.subr.bf16.mxu0 %v957_v3  ;;  %974 = vmatprep.subr.bf16.mxu1 %v957_v3 }
  0xfb   :  { %v338_v10 = vadd.f32 %v876_v8, %v141_v6  ;;  %v332_v11 = vpop.f32.mrb[15].mxu0  ;;  %960 = vmatpush3.bf16.msra.mxu0 %v957_v3  ;;  %982 = vmatpush3.bf16.msra.mxu1 %v957_v3  ;;  %v659_v39 = vpop.permute.xlu0 %658 }
  0xfc   :  { %v961_v12 = vpack.c.bf16 %v354_v5, %v353_v7  ;;  %v333_v13 = vadd.f32 %v332_v11, %v136_v9  ;;  %v669_v42 = vpop.permute.xlu1 %668 }
  0xfd   :  { %v356_v14 = vmax.f32 %v338_v10, 0.0 }
  0xfe   :  { %v355_v15 = vmax.f32 %v333_v13, 0.0  ;;  %962 = vmatprep.subr.bf16.mxu0 %v961_v12  ;;  %975 = vmatprep.subr.bf16.mxu1 %v961_v12 }
  0xff   :  { %964 = vmatpush3.bf16.msra.mxu0 %v961_v12  ;;  %983 = vmatpush3.bf16.msra.mxu1 %v961_v12  ;;  %v422_v41 = vpop.permute.xlu0 %421 }
 0x100   :  { %v965_v16 = vpack.c.bf16 %v356_v14, %v355_v15  ;;  %v674_v44 = vpop.permute.xlu1 %673 }
 0x102   :  { %966 = vmatprep.subr.bf16.mxu0 %v965_v16  ;;  %976 = vmatprep.subr.bf16.mxu1 %v965_v16 }
 0x103   :  { %968 = vmatpush3.bf16.msra.mxu0 %v965_v16  ;;  %984 = vmatpush3.bf16.msra.mxu1 %v965_v16  ;;  %v427_v43 = vpop.permute.xlu0 %426 }
 0x104   :  { %v679_v46 = vpop.permute.xlu1 %678 }
 0x106   :  { %910 = vmatmul.mubr.f32.vlgmr.msra.gmra.mrb[16].mxu0 %v358_v17  ;;  %919 = vmatmul.mubr.f32.vlgmr.msra.gmra.mrb[0].mxu1 %v364_v18 }
 0x107   :  { %912 = vmatprep.mubr.f32.mxu0 %v359_v19  ;;  %921 = vmatprep.mubr.f32.mxu1 %v365_v20  ;;  %v432_v45 = vpop.permute.xlu0 %431 }
 0x108   :  { %v684_v48 = vpop.permute.xlu1 %683 }
 0x10a   :  { %913 = vmatmul.mubr.f32.gmra.mrb[18].mxu0 %v360_v21  ;;  %922 = vmatmul.mubr.f32.gmra.mrb[2].mxu1 %v366_v22 }
 0x10b   :  { %915 = vmatprep.mubr.f32.mxu0 %v361_v23  ;;  %924 = vmatprep.mubr.f32.mxu1 %v367_v24  ;;  %v437_v47 = vpop.permute.xlu0 %436 }
 0x10c   :  { %v689_v50 = vpop.permute.xlu1 %688 }
 0x10e   :  { %916 = vmatmul.mubr.f32.gmra.mrb[20].mxu0 %v362_v25  ;;  %925 = vmatmul.mubr.f32.gmra.mrb[4].mxu1 %v368_v26 }
 0x10f   :  { %927 = vmatprep.mubr.f32.mxu1 %v369_v27  ;;  %v442_v49 = vpop.permute.xlu0 %441 }
 0x110   :  { %v694_v58 = vpop.permute.xlu1 %693 }
 0x112   :  { %928 = vmatmul.mubr.f32.gmra.mrb[6].mxu1 %v370_v28 }
 0x113   :  { %930 = vmatprep.mubr.f32.mxu1 %v371_v29  ;;  %v447_v51 = vpop.permute.xlu0 %446 }
 0x114   :  { %v699_v17 = vpop.permute.xlu1 %698 }
 0x116   :  { %931 = vmatmul.mubr.f32.gmra.mrb[8].mxu1 %v372_v30 }
 0x117   :  { %v452_v5 = vpop.permute.xlu0 %451 }
 0x11b   :  { %v457_v29 = vpop.permute.xlu0 %456 }
 0x1d9   :  { %v911_v52 = vpop.f32.mrb[16].mxu0  ;;  %v920_v53 = vpop.f32.mrb[0].mxu1 }
 0x1da   :  { %v541_v54 = vadd.f32 %v911_v52, %v397_v32  ;;  %v535_v55 = vpop.f32.mrb[17].mxu0  ;;  %v565_v56 = vpop.f32.mrb[1].mxu1  ;;  %v571_v18 = vadd.f32 %v920_v53, %v427_v43 }
 0x1db   :  { %v536_v57 = vadd.f32 %v535_v55, %v392_v31  ;;  %v566_v14 = vadd.f32 %v565_v56, %v422_v41 }
 0x1dc   :  { %v615_v59 = vmax.f32 %v541_v54, 0.0  ;;  %v621_v30 = vmax.f32 %v571_v18, 0.0  ;;  %v462_v54 = vpop.permute.xlu0 %461 }
 0x1dd   :  { %v614_v60 = vmax.f32 %v536_v57, 0.0  ;;  %v914_v61 = vpop.f32.mrb[18].mxu0  ;;  %v923_v62 = vpop.f32.mrb[2].mxu1  ;;  %v620_v25 = vmax.f32 %v566_v14, 0.0 }
 0x1de   :  { %v727_v63 = vmul.f32 %v654_v38, %v615_v59  ;;  %v551_v0 = vadd.f32 %v914_v61, %v407_v34  ;;  %v545_v1 = vpop.f32.mrb[19].mxu0  ;;  %v575_v2 = vpop.f32.mrb[3].mxu1  ;;  %v581_v31 = vadd.f32 %v923_v62, %v437_v47  ;;  %v733_v41 = vmul.f32 %v684_v48, %v621_v30 }
 0x1df   :  { %v726_v3 = vmul.f32 %v649_v37, %v614_v60  ;;  %v546_v4 = vadd.f32 %v545_v1, %v402_v33  ;;  %v576_v26 = vadd.f32 %v575_v2, %v432_v45  ;;  %v732_v37 = vmul.f32 %v679_v46, %v620_v25 }
 0x1e0   :  { %v617_v7 = vmax.f32 %v551_v0, 0.0  ;;  %v623_v43 = vmax.f32 %v581_v31, 0.0  ;;  %v467_v0 = vpop.permute.xlu0 %466 }
 0x1e1   :  { %v742_v6 = vadd.f32 %v727_v63, %v726_v3  ;;  %v616_v8 = vmax.f32 %v546_v4, 0.0  ;;  %v917_v9 = vpop.f32.mrb[20].mxu0  ;;  %v926_v10 = vpop.f32.mrb[4].mxu1  ;;  %v622_v38 = vmax.f32 %v576_v26, 0.0 }
 0x1e2   :  { %v561_v11 = vadd.f32 %v917_v9, %v417_v36  ;;  %v555_v12 = vpop.f32.mrb[21].mxu0  ;;  %v585_v13 = vpop.f32.mrb[5].mxu1  ;;  %v729_v19 = vmul.f32 %v664_v40, %v617_v7  ;;  %v591_v52 = vadd.f32 %v926_v10, %v447_v51  ;;  %v735_v47 = vmul.f32 %v694_v58, %v623_v43 }
 0x1e3   :  { %v728_v15 = vmul.f32 %v659_v39, %v616_v8  ;;  %v556_v16 = vadd.f32 %v555_v12, %v412_v35  ;;  %v704_v36 = vpop.permute.xlu1 %703  ;;  %v586_v40 = vadd.f32 %v585_v13, %v442_v49  ;;  %v734_v45 = vmul.f32 %v689_v50, %v622_v38 }
 0x1e4   :  { %v619_v21 = vmax.f32 %v561_v11, 0.0  ;;  %v719_v58 = vpop.permute.xlu0 %718  ;;  %v769_v13 = vlaneseq }
 0x1e5   :  { %v743_v20 = vadd.f32 %v742_v6, %v728_v15  ;;  %v618_v22 = vmax.f32 %v556_v16, 0.0  ;;  %v929_v23 = vpop.f32.mrb[6].mxu1 }
 0x1e6   :  { %v595_v24 = vpop.f32.mrb[7].mxu1  ;;  %v731_v32 = vmul.f32 %v674_v44, %v619_v21  ;;  %v625_v44 = vmax.f32 %v591_v52, 0.0  ;;  %v601_v60 = vadd.f32 %v929_v23, %v457_v29  ;;  %v770_v16 = vshrl.u32 %v769_v13, 7 }
 0x1e7   :  { %v730_v27 = vmul.f32 %v669_v42, %v618_v22  ;;  %v744_v28 = vadd.f32 %v743_v20, %v729_v19  ;;  %v624_v42 = vmax.f32 %v586_v40, 0.0  ;;  %v596_v56 = vadd.f32 %v595_v24, %v452_v5  ;;  %v709_v57 = vpop.permute.xlu1 %708 }
 0x1e8   :  { %v737_v49 = vmul.f32 %v704_v36, %v625_v44  ;;  %v627_v1 = vmax.f32 %v601_v60, 0.0  ;;  %v771_v19 = vsub.s32 0, %v770_v16  ;;  %v767_v21 = vpop.permute.xlu0 %766 }
 0x1e9   :  { %v745_v33 = vadd.f32 %v744_v28, %v730_v27  ;;  %v932_v34 = vpop.f32.mrb[8].mxu1  ;;  %v736_v61 = vmul.f32 %v699_v17, %v624_v42  ;;  %v626_v46 = vmax.f32 %v596_v56, 0.0 }
 0x1ea   :  { %v605_v35 = vpop.f32.mrb[9].mxu1  ;;  %v611_v51 = vadd.f32 %v932_v34, %v467_v0  ;;  %v772_v23 = vrot.slane %v767_v21, %v771_v19 }
 0x1eb   :  { %v746_v39 = vadd.f32 %v745_v33, %v731_v32  ;;  %v606_v63 = vadd.f32 %v605_v35, %v462_v54  ;;  %v714_v2 = vpop.permute.xlu1 %713  ;;  %v738_v3 = vmul.f32 %v709_v57, %v626_v46 }
 0x1ec   :  { %v739_v6 = vmul.f32 %v714_v2, %v627_v1  ;;  %v629_v7 = vmax.f32 %v611_v51, 0.0 }
 0x1ed   :  { %v747_v53 = vadd.f32 %v746_v39, %v732_v37  ;;  %v628_v4 = vmax.f32 %v606_v63, 0.0 }
 0x1ef   :  { %v748_v55 = vadd.f32 %v747_v53, %v733_v41  ;;  %v740_v8 = vmul.f32 %v719_v58, %v628_v4  ;;  %v724_v10 = vpop.permute.xlu1 %723 }
 0x1f0   :  { %v741_v11 = vmul.f32 %v724_v10, %v629_v7 }
 0x1f1   :  { %v749_v59 = vadd.f32 %v748_v55, %v734_v45 }
 0x1f3   :  { %v750_v62 = vadd.f32 %v749_v59, %v735_v47 }
 0x1f5   :  { %v751_v48 = vadd.f32 %v750_v62, %v736_v61 }
 0x1f7   :  { %v752_v50 = vadd.f32 %v751_v48, %v737_v49 }
 0x1f9   :  { %v753_v5 = vadd.f32 %v752_v50, %v738_v3 }
 0x1fb   :  { %v754_v9 = vadd.f32 %v753_v5, %v739_v6 }
 0x1fd   :  { %v755_v12 = vadd.f32 %v754_v9, %v740_v8 }
 0x1ff   :  { %v756_v14 = vadd.f32 %v755_v12, %v741_v11 }
 0x201   :  { %v757_v15 = vrot.slane %v756_v14, 4 }
 0x203   :  { %v758_v17 = vadd.f32 %v757_v15, %v756_v14 }
 0x205   :  { %v759_v18 = vrot.slane %v758_v17, 2 }
 0x207   :  { %v760_v20 = vadd.f32 %v759_v18, %v758_v17 }
 0x209   :  { %v761_v22 = vrot.slane %v760_v20, 1 }
 0x20b   :  { %v762_v24 = vadd.f32 %v761_v22, %v760_v20 }
 0x20d   :  { %v773_v25 = vadd.f32 %v772_v23, %v762_v24 }
 0x20f   :  { %774 = vst [vmem:[%s1307_s7] sm:$0x1] %v773_v25 }

</bundles_post_ra>
